<compile_context>
chip_gen: v7x
topology: tpu7x:2x2x1
jax: 0.10.0
libtpu: 0.0.40
codegen_flags: <defaults>
</compile_context>

<pallas_src>
import functools

import jax
import jax.numpy as jnp
from jax.experimental import pallas as pl
from jax.experimental.pallas import tpu as pltpu


# ----------------------------------------------------------------------------
# Helpers shared by kernels and pure-JAX references
# ----------------------------------------------------------------------------
_SQRT_HALF = 0.7071067811865476
_USE_TANH_GELU = False   # flip if bundle dumps show erf (VALU polynomial) is the binding slot


def _gelu(x):
    if _USE_TANH_GELU:
        return jax.nn.gelu(x, approximate=True)       # tanh -> EUP slot
    # torch nn.GELU() default is the exact (erf) formulation.
    return 0.5 * x * (1.0 + jax.lax.erf(x * jnp.float32(_SQRT_HALF)))


def _layer_norm_channels(z, gamma, beta, eps=1e-6):
    """SAM LayerNorm2d over channels; channels live on axis 0 (sublanes) here."""
    u = jnp.mean(z, axis=0, keepdims=True)
    s = jnp.mean((z - u) ** 2, axis=0, keepdims=True)
    return (z - u) * jax.lax.rsqrt(s + eps) * gamma + beta


def _layer_norm_last(h, gamma, beta, eps=1e-6):
    """Channel-last variant, used only by the pure-JAX reference."""
    u = jnp.mean(h, axis=-1, keepdims=True)
    s = jnp.mean((h - u) ** 2, axis=-1, keepdims=True)
    return (h - u) * jax.lax.rsqrt(s + eps) * gamma + beta


# ----------------------------------------------------------------------------
# Pallas kernel 1: preprocess -> (x - mean) * (1/std) written into padded square output
#   grid = (B, C, img_size//th); every output element is stored exactly once.
# ----------------------------------------------------------------------------
def _preprocess_tiled_kernel(mean_ref, istd_ref, x_ref, o_ref, *,
                             valid_h, valid_w, th, img_size):
    c = pl.program_id(1)
    i = pl.program_id(2)
    # Native-dtype image is cast to f32 on the VPU (free; halves/quarters HBM reads
    # when the source is bf16/uint8).
    v = (x_ref[0, 0].astype(jnp.float32) - mean_ref[c]) * istd_ref[c]   # (th, valid_w)
    if valid_h < img_size:                                              # static
        row = jax.lax.broadcasted_iota(jnp.int32, v.shape, 0) + i * th
        v = jnp.where(row < valid_h, v, jnp.float32(0.0))
    o_ref[0, 0, :, :valid_w] = v
    if valid_w < img_size:                                              # static
        o_ref[0, 0, :, valid_w:] = jnp.zeros((th, img_size - valid_w), jnp.float32)


def _preprocess_whole_kernel(mean_ref, istd_ref, x_ref, o_ref, *,
                             valid_h, valid_w, img_size):
    c = pl.program_id(1)
    v = (x_ref[0, 0].astype(jnp.float32) - mean_ref[c]) * istd_ref[c]   # (H, W)
    o_ref[0, 0, :valid_h, :valid_w] = v
    if valid_w < img_size:
        o_ref[0, 0, :valid_h, valid_w:] = jnp.zeros(
            (valid_h, img_size - valid_w), jnp.float32)
    if valid_h < img_size:
        o_ref[0, 0, valid_h:, :] = jnp.zeros(
            (img_size - valid_h, img_size), jnp.float32)


def _pick_h_tile(img_size, h):
    for t in (256, 128, 64, 32, 16, 8):
        if t <= h and img_size % t == 0:
            return t
    return None


def preprocess_pallas(x, pixel_mean, pixel_std, img_size):
    """Normalize pixel values and pad bottom/right to (img_size, img_size) in one pass."""
    B, C, H, W = x.shape
    mean = pixel_mean.astype(jnp.float32)
    istd = (1.0 / pixel_std).astype(jnp.float32)          # reciprocal-multiply
    th = _pick_h_tile(img_size, H)

    if th is not None:
        n_in = -(-H // th)                                # #row-blocks covering the input
        kernel = functools.partial(_preprocess_tiled_kernel, valid_h=H,
                                   valid_w=W, th=th, img_size=img_size)
        return pl.pallas_call(
            kernel,
            out_shape=jax.ShapeDtypeStruct((B, C, img_size, img_size), jnp.float32),
            grid=(B, C, img_size // th),
            in_specs=[
                pl.BlockSpec(memory_space=pltpu.MemorySpace.SMEM),   # mean (C,)
                pl.BlockSpec(memory_space=pltpu.MemorySpace.SMEM),   # 1/std (C,)
                # Clamp the input row-block index; tiles past the valid rows are
                # fully masked to zero inside the kernel.
                pl.BlockSpec((1, 1, th, W),
                             lambda b, c, i: (b, c, jnp.minimum(i, n_in - 1), 0)),
            ],
            out_specs=pl.BlockSpec((1, 1, th, img_size),
                                   lambda b, c, i: (b, c, i, 0)),
            compiler_params=pltpu.CompilerParams(
                dimension_semantics=("parallel", "parallel", "parallel")),
        )(mean, istd, x)

    # Fallback for degenerate shapes (H < 8 or img_size not 8-divisible).
    kernel = functools.partial(_preprocess_whole_kernel, valid_h=H,
                               valid_w=W, img_size=img_size)
    return pl.pallas_call(
        kernel,
        out_shape=jax.ShapeDtypeStruct((B, C, img_size, img_size), jnp.float32),
        grid=(B, C),
        in_specs=[
            pl.BlockSpec(memory_space=pltpu.MemorySpace.SMEM),
            pl.BlockSpec(memory_space=pltpu.MemorySpace.SMEM),
            pl.BlockSpec((1, 1, H, W), lambda b, c: (b, c, 0, 0)),
        ],
        out_specs=pl.BlockSpec((1, 1, img_size, img_size), lambda b, c: (b, c, 0, 0)),
        compiler_params=pltpu.CompilerParams(
            dimension_semantics=("parallel", "parallel")),
    )(mean, istd, x)


def preprocess_reference(x, pixel_mean, pixel_std, img_size):
    B, C, H, W = x.shape
    normed = (x.astype(jnp.float32) - pixel_mean.reshape(1, C, 1, 1)) \
        / pixel_std.reshape(1, C, 1, 1)
    return jnp.pad(normed, ((0, 0), (0, 0), (0, img_size - H), (0, img_size - W)))


# ----------------------------------------------------------------------------
# Pallas kernel 2: fused 4x SPGen heads + mean + sigmoid + attention-bias fill
#   grid = (B, spatial_tiles), both 'parallel'; all 4 heads handled in the body.
#   Layout: channels on sublanes, spatial positions on lanes -> lane-dense outputs.
# ----------------------------------------------------------------------------
def _spgen_fused_kernel(emb_ref, sto_ref, w1t_ref, b1_ref, g1_ref, bb1_ref,
                        w2t_ref, b2_ref, g2_ref, bb2_ref, w3_ref, b3_ref,
                        cm_ref, prob_ref, attn_ref):
    n_stored = sto_ref.shape[0]
    n_heads = n_stored + 1

    def head_map(x_f32, h):
        x = x_f32.astype(jnp.bfloat16)                                   # (C, tm) bf16
        z = jnp.dot(w1t_ref[h], x, preferred_element_type=jnp.float32) + b1_ref[h]
        z = _gelu(_layer_norm_channels(z, g1_ref[h], bb1_ref[h]))        # (64, tm)
        z = jnp.dot(w2t_ref[h], z.astype(jnp.bfloat16),
                    preferred_element_type=jnp.float32) + b2_ref[h]
        z = _gelu(_layer_norm_channels(z, g2_ref[h], bb2_ref[h]))        # (16, tm)
        # Final 16 -> 1 "conv" as a sublane reduction; result is lane-dense (1, tm).
        return jnp.sum(z * w3_ref[h], axis=0, keepdims=True) + b3_ref[h]

    # Static unroll over the 4 heads; contributions accumulate in vregs.
    acc = head_map(emb_ref[0], 0)
    for s in range(n_stored):
        acc = acc + head_map(sto_ref[s, 0], s + 1)

    mean = acc * jnp.float32(1.0 / n_heads)
    p = jax.nn.sigmoid(mean)
    cm_ref[0] = mean
    prob_ref[0] = p
    # masked_fill(sigmoid(coarse_mask) < 0.5, -1e9) on a zeros tensor
    attn_ref[0] = jnp.where(p < jnp.float32(0.5),
                            jnp.float32(-1000000000.0), jnp.float32(0.0))


def _pick_spatial_tile(s):
    # Prefer 512 (review: cap at 512 to limit vreg pressure), then smaller tiles.
    for t in (512, 256, 128):
        if s % t == 0:
            return t
    return s   # fall back to full spatial extent (allowed: block == full dim)


def spgen_fused_pallas(image_embeddings, stored_states, params):
    """4x SPGen heads + mean + sigmoid + attn-bias in one kernel.

    Returns (coarse_mask (B,1,He,We) f32, spgen_prob (B,1,He,We) f32, attn_bias (B,He*We) f32).
    """
    head_params = [params["spgen0"], params["spgen1"], params["spgen2"], params["spgen3"]]
    B, C, He, We = image_embeddings.shape
    n_stored = stored_states.shape[0]
    assert len(head_params) == n_stored + 1
    S = He * We

    # Keep channel-first layout; only merge the two minor spatial dims (cheap).
    # No stack, no transpose, no wrapper bf16 cast -> single HBM pass over the features.
    emb2 = image_embeddings.reshape(B, C, S)
    sto2 = stored_states.reshape(n_stored, B, C, S)

    stack = lambda name, tr=False: jnp.stack(
        [p[name].T if tr else p[name] for p in head_params], axis=0)
    w1t = stack("w1", tr=True).astype(jnp.bfloat16)      # (4, 64, 256)
    w2t = stack("w2", tr=True).astype(jnp.bfloat16)      # (4, 16, 64)
    b1s = stack("b1", tr=True)                           # (4, 64, 1) f32
    g1s = stack("g1", tr=True)
    bb1s = stack("bb1", tr=True)
    b2s = stack("b2", tr=True)                           # (4, 16, 1) f32
    g2s = stack("g2", tr=True)
    bb2s = stack("bb2", tr=True)
    w3s = stack("w3")                                    # (4, 16, 1) f32
    b3s = stack("b3")                                    # (4, 1, 1) f32

    tm = _pick_spatial_tile(S)
    grid = (B, S // tm)

    def full_spec(a):
        return pl.BlockSpec(a.shape, lambda b, i: (0,) * a.ndim)  # resident, DMA'd once

    in_specs = [
        pl.BlockSpec((1, C, tm), lambda b, i: (b, 0, i)),
        pl.BlockSpec((n_stored, 1, C, tm), lambda b, i: (0, b, 0, i)),
    ] + [full_spec(a) for a in (w1t, b1s, g1s, bb1s, w2t, b2s, g2s, bb2s, w3s, b3s)]

    out_spec = pl.BlockSpec((1, 1, tm), lambda b, i: (b, 0, i))     # lane-dense outputs

    cm, prob, attn = pl.pallas_call(
        _spgen_fused_kernel,
        out_shape=(jax.ShapeDtypeStruct((B, 1, S), jnp.float32),) * 3,
        grid=grid,
        in_specs=in_specs,
        out_specs=(out_spec,) * 3,
        compiler_params=pltpu.CompilerParams(
            dimension_semantics=("parallel", "parallel")),
    )(emb2, sto2, w1t, b1s, g1s, bb1s, w2t, b2s, g2s, bb2s, w3s, b3s)

    return (cm.reshape(B, 1, He, We), prob.reshape(B, 1, He, We), attn.reshape(B, S))


def sam_heads_reference(image_embeddings, stored_states, params):
    """Pure-JAX reference of the fused SPGen heads (same bf16 matmul precision)."""
    head_params = [params["spgen0"], params["spgen1"], params["spgen2"], params["spgen3"]]
    feats = [image_embeddings, stored_states[0], stored_states[1], stored_states[2]]
    maps = []
    for f, p in zip(feats, head_params):
        B, C, H, W = f.shape
        x = jnp.transpose(f, (0, 2, 3, 1)).reshape(-1, C).astype(jnp.bfloat16)
        h = jnp.dot(x, p["w1"].astype(jnp.bfloat16),
                    preferred_element_type=jnp.float32) + p["b1"]
        h = _gelu(_layer_norm_last(h, p["g1"], p["bb1"]))
        h = jnp.dot(h.astype(jnp.bfloat16), p["w2"].astype(jnp.bfloat16),
                    preferred_element_type=jnp.float32) + p["b2"]
        h = _gelu(_layer_norm_last(h, p["g2"], p["bb2"]))
        m = jnp.sum(h * p["w3"].T, axis=-1) + p["b3"][0, 0]
        maps.append(m.reshape(B, 1, H, W))
    cm = (maps[0] + maps[1] + maps[2] + maps[3]) * 0.25
    prob = jax.nn.sigmoid(cm)
    attn = jnp.where(prob < 0.5, -1000000000.0, 0.0)
    return cm, prob, attn


# ----------------------------------------------------------------------------
# point_selection (top-k) -- plain JAX glue (tiny, data-dependent indices)
# ----------------------------------------------------------------------------
def point_selection(mask, topk=1):
    n_rows, n_cols = mask.shape            # torch divides by mask.shape[1] (columns)
    flat = mask.reshape(-1)
    top_idx = jax.lax.top_k(flat, topk)[1]
    top_r = top_idx // n_cols
    top_c = top_idx - top_r * n_cols
    topk_xy = jnp.stack([top_c, top_r], axis=1)          # (x, y) order like the torch ref
    topk_label = jnp.ones((topk,), jnp.int32)
    last_idx = jax.lax.top_k(-flat, topk)[1]
    last_r = last_idx // n_cols
    last_c = last_idx - last_r * n_cols
    last_xy = jnp.stack([last_c, last_r], axis=1)
    last_label = jnp.zeros((topk,), jnp.int32)
    return topk_xy, topk_label, last_xy, last_label


def _per_sample_outputs(coarse_up16_b, prob_b, emb_b):
    # coarse_up16_b: (1, S, S), prob_b: (1, He, We), emb_b: (C, He, We)
    txy, tl, lxy, ll = point_selection(coarse_up16_b[0], topk=2)
    point_coords = jnp.concatenate([txy, lxy], axis=0)             # (4, 2)
    point_labels = jnp.concatenate([tl, ll], axis=0)               # (4,)
    image_feat = jnp.transpose(emb_b, (1, 2, 0))                   # (He, We, C)
    sel = (prob_b[0] > 0.5).astype(jnp.float32)
    cnt = jnp.sum(sel)
    tsum = jnp.sum(image_feat * sel[..., None], axis=(0, 1))
    # torch sets target_embedding=None when no pixel passes the threshold;
    # here: zero vector + boolean flag instead of NaN.
    target_embedding = jnp.where(cnt > 0, tsum / jnp.maximum(cnt, 1.0),
                                 jnp.zeros_like(tsum))
    has_target = cnt > 0
    return point_coords, point_labels, target_embedding, has_target


# ----------------------------------------------------------------------------
# Sam.forward_train (Pallas kernels + JAX glue)
# ----------------------------------------------------------------------------
def sam_forward_train(image, image_embeddings, stored_states, params,
                      image_size, img_size):
    B = image.shape[0]
    input_images = preprocess_pallas(image, params["pixel_mean"],
                                     params["pixel_std"], img_size)
    # TODO(synk): ImageEncoderViT is an external submodule not provided here;
    # image_embeddings / stored_states are supplied as inputs instead of being computed.

    coarse_mask, spgen_prob, attn_flat = spgen_fused_pallas(
        image_embeddings, stored_states, params)
    He, We = coarse_mask.shape[-2:]

    s4 = image_size // 4
    coarse_mask_up4 = jax.image.resize(coarse_mask, (B, 1, s4, s4), method="bilinear")
    coarse_mask_up16 = jax.image.resize(coarse_mask, (B, 1, image_size, image_size),
                                        method="bilinear")

    point_coords, point_labels, target_emb, has_target = jax.vmap(_per_sample_outputs)(
        coarse_mask_up16, spgen_prob, image_embeddings)

    # TODO(synk): prompt_encoder, mask_decoder and postprocess_masks are external submodules;
    # 'masks' / 'iou_predictions' / 'low_res_logits' are therefore omitted.
    outputs = {
        "input_images": input_images,
        "coarse_mask": coarse_mask,
        "spgen_prob": spgen_prob,
        "coarse_mask_up16": coarse_mask_up16,
        "attn_mask": attn_flat.reshape(B, 1, 1, 1, He * We),
        "point_coords": point_coords[:, None],             # (B, 1, 4, 2)
        "point_labels": point_labels[:, None],             # (B, 1, 4)
        "target_embedding": target_emb[:, None, None, :],  # (B, 1, 1, 256)
        "has_target_embedding": has_target,                # (B,) bool
    }
    return outputs, coarse_mask_up4


# ----------------------------------------------------------------------------
# Deterministic parameter init (shapes from SPGen.__init__)
# ----------------------------------------------------------------------------
def init_spgen_params(key):
    k = jax.random.split(key, 6)

    def conv_w(kk, cin, cout):
        return (jax.random.normal(kk, (cin, cout), jnp.float32)
                / jnp.sqrt(jnp.float32(cin)))

    return {
        "w1": conv_w(k[0], 256, 64),
        "b1": 0.01 * jax.random.normal(k[1], (1, 64), jnp.float32),
        "g1": jnp.ones((1, 64), jnp.float32),
        "bb1": jnp.zeros((1, 64), jnp.float32),
        "w2": conv_w(k[2], 64, 16),
        "b2": 0.01 * jax.random.normal(k[3], (1, 16), jnp.float32),
        "g2": jnp.ones((1, 16), jnp.float32),
        "bb2": jnp.zeros((1, 16), jnp.float32),
        "w3": conv_w(k[4], 16, 1),
        "b3": 0.01 * jax.random.normal(k[5], (1, 1), jnp.float32),
    }


if __name__ == "__main__":
    key = jax.random.PRNGKey(0)
    ks = jax.random.split(key, 8)

    # Small demo shapes consistent with the module's conventions.
    B, C_img, H_img, W_img = 2, 3, 24, 24
    img_size = 32          # image_encoder.img_size (pad target)
    image_size = 32        # forward_train's image_size argument
    He = We = 8            # image-embedding spatial size
    C_emb = 256            # SPGen requires 256 input channels

    image = jax.random.uniform(ks[0], (B, C_img, H_img, W_img), jnp.float32) * 255.0
    image_embeddings = jax.random.normal(ks[1], (B, C_emb, He, We), jnp.float32)
    stored_states = jax.random.normal(ks[2], (3, B, C_emb, He, We), jnp.float32)

    params = {
        "pixel_mean": jnp.array([123.675, 116.28, 103.53], jnp.float32),
        "pixel_std": jnp.array([58.395, 57.12, 57.375], jnp.float32),
        "spgen0": init_spgen_params(ks[3]),
        "spgen1": init_spgen_params(ks[4]),
        "spgen2": init_spgen_params(ks[5]),
        "spgen3": init_spgen_params(ks[6]),
    }

    outputs, coarse_up4 = sam_forward_train(
        image, image_embeddings, stored_states, params, image_size, img_size)
    jax.block_until_ready(outputs)
    jax.block_until_ready(coarse_up4)

    # Numerical sanity checks against pure-JAX references.
    pre_ref = preprocess_reference(image, params["pixel_mean"], params["pixel_std"], img_size)
    assert jnp.allclose(outputs["input_images"], pre_ref, atol=1e-4, rtol=1e-4), \
        "preprocess Pallas mismatch"

    cm_ref, prob_r, attn_r = sam_heads_reference(image_embeddings, stored_states, params)
    assert jnp.allclose(outputs["coarse_mask"], cm_ref, atol=2e-2, rtol=2e-2), \
        "fused SPGen coarse_mask mismatch"
    assert jnp.allclose(outputs["spgen_prob"], prob_r, atol=2e-2, rtol=2e-2), \
        "fused SPGen prob mismatch"

    print("KERNEL_OK")
</pallas_src>

<mosaic_0001>
module attributes {stable_mosaic.version = 11 : i64} {
  func.func @_preprocess_tiled_kernel(%arg0: i32, %arg1: i32, %arg2: i32, %arg3: memref<3xf32, #tpu.memory_space<smem>>, %arg4: memref<3xf32, #tpu.memory_space<smem>>, %arg5: memref<1x1x16x24xf32, #tpu.memory_space<vmem>>, %arg6: memref<1x1x16x32xf32, #tpu.memory_space<vmem>>) attributes {dimension_semantics = [#tpu.dimension_semantics<parallel>, #tpu.dimension_semantics<parallel>, #tpu.dimension_semantics<parallel>], iteration_bounds = array<i64: 2, 3, 2>, scalar_prefetch = 0 : i64, scratch_operands = 0 : i64, tpu.core_type = #tpu.core_type<tc>, window_params = [{transform_indices = @transform_0, window_bounds = array<i64: 3>}, {transform_indices = @transform_1, window_bounds = array<i64: 3>}, {transform_indices = @transform_2, window_bounds = array<i64: 1, 1, 16, 24>}, {transform_indices = @transform_3, window_bounds = array<i64: 1, 1, 16, 32>}]} {
    %c0 = arith.constant 0 : index
    %c0_0 = arith.constant 0 : index
    %c0_1 = arith.constant 0 : index
    %c0_2 = arith.constant 0 : index
    %0 = vector.load %arg5[%c0, %c0_0, %c0_1, %c0_2] : memref<1x1x16x24xf32, #tpu.memory_space<vmem>>, vector<1x1x16x24xf32>
    %1 = vector.shape_cast %0 : vector<1x1x16x24xf32> to vector<16x24xf32>
    %2 = arith.index_cast %arg1 : i32 to index
    %3 = memref.load %arg3[%2] : memref<3xf32, #tpu.memory_space<smem>>
    %4 = vector.broadcast %3 : f32 to vector<16x24xf32>
    %5 = arith.subf %1, %4 : vector<16x24xf32>
    %6 = arith.index_cast %arg1 : i32 to index
    %7 = memref.load %arg4[%6] : memref<3xf32, #tpu.memory_space<smem>>
    %8 = vector.broadcast %7 : f32 to vector<16x24xf32>
    %9 = arith.mulf %5, %8 : vector<16x24xf32>
    %10 = tpu.iota {dimensions = array<i32: 0>} : vector<16x24xi32>
    %c16_i32 = arith.constant 16 : i32
    %11 = arith.muli %arg2, %c16_i32 : i32
    %12 = vector.broadcast %11 : i32 to vector<16x24xi32>
    %13 = arith.addi %10, %12 : vector<16x24xi32>
    %c24_i32 = arith.constant 24 : i32
    %14 = vector.broadcast %c24_i32 : i32 to vector<16x24xi32>
    %15 = arith.cmpi slt, %13, %14 : vector<16x24xi32>
    %cst = arith.constant 0.000000e+00 : f32
    %16 = vector.broadcast %cst : f32 to vector<16x24xf32>
    %17 = arith.select %15, %9, %16 : vector<16x24xi1>, vector<16x24xf32>
    %c0_3 = arith.constant 0 : index
    %c0_4 = arith.constant 0 : index
    %c0_5 = arith.constant 0 : index
    %c0_6 = arith.constant 0 : index
    %18 = vector.load %arg6[%c0_3, %c0_4, %c0_5, %c0_6] : memref<1x1x16x32xf32, #tpu.memory_space<vmem>>, vector<1x1x16x24xf32>
    %19 = vector.shape_cast %18 : vector<1x1x16x24xf32> to vector<16x24xf32>
    %20 = vector.shape_cast %17 : vector<16x24xf32> to vector<1x1x16x24xf32>
    tpu.vector_store %arg6[%c0_3, %c0_4, %c0_5, %c0_6], %20 {strides = array<i32>} : memref<1x1x16x32xf32, #tpu.memory_space<vmem>>, vector<1x1x16x24xf32>,
    %cst_7 = arith.constant 0.000000e+00 : f32
    %21 = vector.broadcast %cst_7 : f32 to vector<16x8xf32>
    %c0_8 = arith.constant 0 : index
    %c0_9 = arith.constant 0 : index
    %c0_10 = arith.constant 0 : index
    %c24 = arith.constant 24 : index
    %22 = vector.load %arg6[%c0_8, %c0_9, %c0_10, %c24] : memref<1x1x16x32xf32, #tpu.memory_space<vmem>>, vector<1x1x16x8xf32>
    %23 = vector.shape_cast %22 : vector<1x1x16x8xf32> to vector<16x8xf32>
    %24 = vector.shape_cast %21 : vector<16x8xf32> to vector<1x1x16x8xf32>
    tpu.vector_store %arg6[%c0_8, %c0_9, %c0_10, %c24], %24 {strides = array<i32>} : memref<1x1x16x32xf32, #tpu.memory_space<vmem>>, vector<1x1x16x8xf32>,
    return
  }
  func.func @transform_0(%arg0: i32, %arg1: i32, %arg2: i32) -> i32 {
    %c0_i32 = arith.constant 0 : i32
    %c0_i32_0 = arith.constant 0 : i32
    return %c0_i32 : i32
  }
  func.func @transform_1(%arg0: i32, %arg1: i32, %arg2: i32) -> i32 {
    %c0_i32 = arith.constant 0 : i32
    %c0_i32_0 = arith.constant 0 : i32
    return %c0_i32 : i32
  }
  func.func @transform_2(%arg0: i32, %arg1: i32, %arg2: i32) -> (i32, i32, i32, i32) {
    %c1_i32 = arith.constant 1 : i32
    %0 = arith.minsi %arg2, %c1_i32 : i32
    %c0_i32 = arith.constant 0 : i32
    %c0_i32_0 = arith.constant 0 : i32
    return %arg0, %arg1, %0, %c0_i32 : i32, i32, i32, i32
  }
  func.func @transform_3(%arg0: i32, %arg1: i32, %arg2: i32) -> (i32, i32, i32, i32) {
    %c0_i32 = arith.constant 0 : i32
    %c0_i32_0 = arith.constant 0 : i32
    return %arg0, %arg1, %arg2, %c0_i32 : i32, i32, i32, i32
  }
}

</mosaic_0001>

<bundles_post_ra>
// kernel: tpu_custom_call.1
= control target key start
LH: loop header
LB: loop body
LE: loop exit
PB: predicated region body
PF: predicated region fallthrough
CT: control target
= control target key end

     0   :  { %s1156_s0 = inlined_call_operand.hbm [shape: f32[3], index: 0, kind: input, shape index: {}]   ;;  %s1157_s1 = inlined_call_operand.vmem [shape: f32[3], index: 1, kind: input, shape index: {}]   ;;  %s1158_s2 = inlined_call_operand.hbm [shape: f32[2,3,24,24], index: 2, kind: input, shape index: {}]   ;;  %s1159_s3 = inlined_call_operand.hbm [shape: f32[2,3,32,32], index: 3, kind: output, shape index: {}]  }
   0x1   :  { %1171 = sst [smem:[#allocation21_spill]] %s1156_s0 }
   0x2   :  { %1172 = sst [smem:[#allocation22_spill]] %s1157_s1 }
   0x3   :  { %1173 = sst [smem:[#allocation23_spill]] %s1159_s3 }
   0x4   :  { %8 = vsyncpa [#allocation5], 0 }
   0x5   :  { %9 = vsyncpa [#allocation6], 0 }
   0x6   :  { %10 = vsyncpa [#allocation3], 0 }
   0x7   :  { %12 = vsyncpa [#allocation3 + $0x1], 0 }
   0x8   :  { %13 = vsyncpa [#allocation4], 0 }
   0x9   :  { %15 = vsyncpa [#allocation4 + $0x1], 0  ;;  %s833_s12 = smov 0   ;;  %s835_s13 = smov 0  }
   0xa   :  { %s837_s14 = smov 0   ;;  %s839_s15 = smov 0  }
   0xb   :  { %s841_s16 = smov 0   ;;  %s843_s17 = smov 0  }
   0xc   :  { %s845_s18 = smov 0   ;;  %s847_s19 = smov 0  }
   0xd   :  { %s849_s20 = smov 0   ;;  %s851_s21 = smov 0  }
   0xe   :  { %s853_s22 = smov 0   ;;  %s855_s23 = smov 0  }
   0xf   :  { %s857_s24 = smov 0  }
  0x10 LB: > { %1174 = sst [smem:[#allocation14_spill]] %s774_s17  ;;  %s1162_s25 = sadd.s32 4294967295, %s802_s24   ;;  %s802_s24 = sphi %s857_s24, %s21_s24   ;;  %s798_s23 = sphi %s855_s23, %s1215_s23   ;;  %s794_s22 = sphi %s853_s22, %s1214_s22   ;;  %s790_s21 = sphi %s851_s21, %s1203_s21   ;;  %s786_s20 = sphi %s849_s20, %s1213_s20   ;;  %s782_s19 = sphi %s847_s19, %s1212_s19   ;;  %s778_s18 = sphi %s845_s18, %s1202_s18   ;;  %s774_s17 = sphi %s843_s17, %s1201_s17   ;;  %s770_s16 = sphi %s841_s16, %s1211_s16   ;;  %s766_s15 = sphi %s839_s15, %s1210_s15   ;;  %s762_s14 = sphi %s837_s14, %s1209_s14   ;;  %s758_s13 = sphi %s835_s13, %s1208_s13   ;;  %s754_s12 = sphi %s833_s12, %s1207_s12  }
  0x11   : > { %1175 = sst [smem:[#allocation15_spill]] %s786_s20  ;;  %s33_s27 = sadd.s32 1, %s790_s21 }
  0x12   : > { %1176 = sst [smem:[#allocation16_spill]] %s790_s21  ;;  %s36_s28 = sadd.s32 1, %s794_s22 }
  0x13   : > { %p34_p0 = scmp.ge.s32.totalorder %s33_s27, 2  ;;  %s40_s29 = sadd.s32 1, %s798_s23 }
  0x14   : > { %p86_p1 = scmp.lt.s32.totalorder %s790_s21, 1  ;;  %s97_s30 = sadd.s32 1, %s774_s17 }
  0x15   : > { %s1217_s27 = smov (%p34_p0, %s33_s27), 0  ;;  %s1219_s28 = smov (!%p34_p0, %s36_s28), %s794_s22 }
  0x16   : > { %1177 = sst [smem:[#allocation17_spill]] %s1217_s27  ;;  %p38_p2 = scmp.ge.s32.totalorder %s1219_s28, 3 }
  0x17   : > { %s909_s4 = scalar_select %p86_p1, %s790_s21, 1 }
  0x18   : > { %p88_p3 = scmp.lt.s32.totalorder %s1217_s27, 1  ;;  %p104_p4 = scmp.ne.s32.totalorder %s774_s17, %s770_s16 }
  0x19   : > { %p105_p5 = scmp.eq.s32.totalorder %s802_s24, 0  ;;  %s1221_s28 = smov (%p38_p2, %s1219_s28), 0 }
  0x1a   : > { %1178 = sst [smem:[#allocation18_spill]] %s1221_s28  ;;  %s1223_s29 = smov (!%p38_p2, %s40_s29), %s798_s23 }
  0x1b   : > { %s89_s5 = scalar_select %p88_p3, %s1217_s27, 1 }
  0x1c   : > { %p42_p6 = scmp.ge.s32.totalorder %s1223_s29, 2  ;;  %s91_s6 = ssub.s32 %s794_s22, %s1221_s28 }
  0x1d   : > { %s93_s7 = ssub.s32 %s909_s4, %s89_s5  ;;  %p922_p7 = por %p105_p5, %p104_p4 }
  0x1e   : > { %s1225_s29 = smov (%p42_p6, %s1223_s29), 0  ;;  %p110_p8 = scmp.ne.s32.totalorder %s770_s16, %s766_s15 }
  0x1f   : > { %1180 = sst [smem:[#allocation19_spill]] %s1225_s29  ;;  %p932_p9 = scmp.eq.s32.totalorder %s1162_s25, 0 }
  0x20   : > { %s90_s10 = ssub.s32 %s798_s23, %s1225_s29  ;;  %s123_s11 = ssub.s32 %s790_s21, %s1217_s27 }
  0x21   : > { %s1181_s9 = scalar_select %p932_p9, 1, 0 }
  0x22   : > { %s92_s5 = sor.u32 %s91_s6, %s90_s10  ;;  %p942_p10 = por %p932_p9, %p110_p8 }
  0x23   : > { %s94_s28 = sor.u32 %s93_s7, %s92_s5  ;;  %s124_s3 = sor.u32 %s123_s11, %s92_s5 }
  0x24   : > { %s1182_s26 = scalar_select %p942_p10, 1, 0 }
  0x25   : > { %p95_p11 = scmp.eq.s32.totalorder %s94_s28, 0  ;;  %p125_p12 = scmp.eq.s32.totalorder %s124_s3, 0 }
  0x26   : > { %s127_s15 = sadd.s32 1, %s762_s14  ;;  %p137_p13 = scmp.ne.s32.totalorder %s762_s14, %s758_s13 }
  0x27   : > { %s950_s25 = scalar_select %p95_p11, %s774_s17, %s97_s30  }
  0x28   : > { %s953_s20 = scalar_select %p125_p12, %s762_s14, %s127_s15  }
  0x29   : > { %1183 = sst [smem:[#allocation20_spill]] %s950_s25  ;;  %s1184_s29 = sadd.s32 4294967295, %s802_s24  }
  0x2a   : > { %p138_p0 = scmp.eq.s32.totalorder %s1184_s29, 11  ;;  %p143_p1 = scmp.ne.s32.totalorder %s758_s13, %s754_s12 }
  0x2b   : > { %s1185_s6 = sadd.s32 4294967294, %s802_s24   ;;  %p436_p3 = scmp.ge.s32.totalorder %s802_s24, 1 }
  0x2c   : > { %p144_p2 = scmp.eq.s32.totalorder %s1185_s6, 11  ;;  %p962_p4 = por %p138_p0, %p137_p13 }
  0x2d   : > { %p151_p5 = scmp.lt.s32.totalorder %s802_s24, 13  ;;  %s1189_s1 = sld [smem:[#allocation22_spill]] }
  0x2e   : > { %s1186_s10 = scalar_select %p962_p4, 1, 0 }
  0x2f   : > { %p967_p6 = por %p144_p2, %p143_p1  ;;  %p971_p8 = pnand %p436_p3, %p151_p5 }
  0x30   : > { %s1191_s0 = sld [smem:[#allocation21_spill]] }
  0x31   : > { %s1187_s28 = scalar_select %p967_p6, 1, 0 }
  0x32   : > { %p473_p11 = pneg %p971_p8 }
  0x33   : > { %s173_s7 = sshll.u32 %s1189_s1, 4  ;;  %s174_s7 = int_to_ptr.vmem [resolvable:$true] %s173_s7 }
  0x34   : > { %p982_p12 = pnand %p473_p11, %p932_p9 }
  0x36   : > { %s600_s6 = scalar_lea.hbm %s1191_s0, 16  ;;  %p602_p0 = pneg %p982_p12 }
  0x37   : > { %p601_p13 = scmp.ne.s32.totalorder %s1191_s0, %s600_s6  ;;  %p607_p3 = scmp.lt.u32.totalorder %s600_s6, %s1191_s0 }
  0x39   : > { %p603_p1 = pnand %p602_p0, %p601_p13 }
  0x3b   : > { %p604_p2 = pneg %p603_p1 }
  0x3d   : > { %p609_p5 = pnand %p607_p3, %p604_p2 }
  0x3f   : > { %612 = shalt.err (!%p609_p5)
}
  0x40   : > { %s804_s1 = smov [#allocation2]   ;;  %s613_s15 = scalar_lea.vmem %s174_s7, 16 }
  0x41   : > { %476 = dma.hbm_to_smem (!%p982_p12), %s1191_s0, 16, %s804_s1, [#allocation5]  }
  0x42   : > { %p614_p11 = scmp.ne.s32.totalorder %s174_s7, %s613_s15  ;;  %p621_p10 = scmp.lt.s32.totalorder %s174_s7, %s174_s7 }
  0x43   : > { %p622_p13 = scmp.lt.s32.totalorder %s613_s15, %s613_s15 }
  0x44   : > { %p616_p6 = pnand %p614_p11, %p602_p0 }
  0x45   : > { %p623_p1 = por %p622_p13, %p621_p10 }
  0x46   : > { %p617_p4 = pneg %p616_p6 }
  0x48   : > { %p624_p9 = pnand %p623_p1, %p617_p4 }
  0x4a   : > { %627 = shalt.err (!%p624_p9)
}
  0x4b   : > { %s805_s21 = smov [#allocation7]   ;;  %p439_p2 = scmp.ge.s32.totalorder %s802_s24, 12 }
  0x4c   : > { %479 = dma.vmem_to_smem (!%p982_p12), %s174_s7, 16, %s805_s21, [#allocation6]  }
  0x4d   : > { %180 = sbr.rel (%p439_p2) target bundleno = 122 (0x7a), region = 24 }
  0x54   : > { %183 = sbr.rel (!%p922_p7) target bundleno = 122 (0x7a), region = 28  ;;  %s184_s1 = sand.u32 (%p922_p7), 1, %s774_s17  }
  0x55   : > { %s441_s25 = sshll.u32 (%p922_p7), %s909_s4, 1  ;;  %s440_s27 = sshll.u32 (%p922_p7), %s184_s1, 4 }
  0x56   : > { %s192_s6 = ssub.s32 (%p922_p7), 3, %s441_s25  ;;  %s1012_s11 = scalar_lea.sflag (%p922_p7), [#allocation3], %s184_s1 }
  0x57   : > { %p193_p6 = scmp.lt.s32.totalorder (%p922_p7), %s192_s6, 2  ;;  %s188_s7 = scalar_lea.vmem (%p922_p7), [#allocation8], %s440_s27 }
  0x5b   : > { %s1227_s6 = smov (!%p193_p6, %s192_s6), 2 }
  0x5c   : > { %s1009_s29 = sshll.u32 %s1227_s6, 7 }
  0x5d   : > { %s197_s30 = ssub.s32 256, %s1009_s29 }
  0x5e   : > { %198 = vsyncadd %s1012_s11, %s197_s30  ;;  %p443_p7 = scmp.ne.s32.totalorder %s1009_s29, 0  ;;  %s459_s4 = smul.u32 3, %s794_s22 }
  0x5f   : > { %s460_s8 = smul.u32 9, %s798_s23  ;;  %s207_s5 = sshll.u32 %s188_s7, 4  ;;  %s1018_s5 = int_to_ptr.vmem [resolvable:$true] %s207_s5 }
  0x60   : > { %s201_s15 = sadd.s32 %s459_s4, %s441_s25  ;;  %s632_s7 = scalar_lea.hbm %s1158_s2, 2304 }
  0x61   : > { %s203_s21 = sadd.s32 %s460_s8, %s201_s15 }
  0x62   : > { %s444_s6 = sshll.u32 %s203_s21, 7 }
  0x63   : > { %s1023_s17 = scalar_lea.hbm %s1158_s2, %s444_s6 }
  0x64   : > { %s628_s27 = scalar_lea.hbm %s1023_s17, %s1009_s29  ;;  %p633_p12 = scmp.lt.u32.totalorder %s1023_s17, %s1158_s2 }
  0x65   : > { %p629_p9 = scmp.ne.s32.totalorder %s1023_s17, %s628_s27  ;;  %p634_p0 = scmp.lt.u32.totalorder %s632_s7, %s628_s27 }
  0x66   : > { %p636_p5 = scmp.lt.u32.totalorder %s628_s27, %s1023_s17 }
  0x67   : > { %p630_p10 = pnand %p629_p9, %p443_p7  ;;  %p635_p3 = por %p634_p0, %p633_p12 }
  0x69   : > { %p631_p4 = pneg %p630_p10  ;;  %p637_p11 = por %p636_p5, %p635_p3 }
  0x6b   : > { %p638_p13 = pnand %p637_p11, %p631_p4 }
  0x6d   : > { %641 = shalt.err (!%p638_p13)
}
  0x6e   : > { %s642_s0 = scalar_lea.vmem %s1018_s5, %s1009_s29  ;;  %s806_s15 = smov [#allocation8]  }
  0x6f   : > { %p643_p1 = scmp.ne.s32.totalorder %s1018_s5, %s642_s0  ;;  %s646_s21 = sshll.u32 %s806_s15, 4  ;;  %s647_s21 = int_to_ptr.vmem [resolvable:$false] %s646_s21 }
  0x70   : > { %s648_s6 = scalar_lea.vmem %s647_s21, 512  ;;  %p649_p9 = scmp.lt.s32.totalorder %s1018_s5, %s647_s21 }
  0x71   : > { %p644_p2 = pnand %p643_p1, %p443_p7  ;;  %p650_p10 = scmp.lt.s32.totalorder %s648_s6, %s642_s0 }
  0x73   : > { %p645_p6 = pneg %p644_p2  ;;  %p651_p12 = por %p650_p10, %p649_p9 }
  0x75   : > { %p652_p0 = pnand %p651_p12, %p645_p6 }
  0x77   : > { %655 = shalt.err (!%p652_p0)
}
  0x78   : > { %s807_s1 = smov 128   ;;  %s808_s27 = smov 8  }
  0x79   : > { %213 = dma.hbm_to_vmem [thread:$0]  (%p443_p7), %s1023_s17, %s1009_s29, %s1018_s5, %s1012_s11, %s807_s1, %s807_s1, %s808_s27  }
  0x7a PF: > { %219 = sbr.rel (%p971_p8) target bundleno = 171 (0xab), region = 32  ;;  %p1192_p4 = scmp.ne.s32.totalorder (!%p971_p8), %s1181_s9, 0 }
  0x81   : > { %737 = dma.done.wait (%p1192_p4), [#allocation5], 16  }
  0x82   : > { %739 = vsyncadd (%p1192_p4), [#allocation5], 4294967280 }
  0x83   : > { %741 = dma.done.wait (%p1192_p4), [#allocation6], 16  }
  0x84   : > { %743 = vsyncadd (%p1192_p4), [#allocation6], 4294967280  ;;  %s229_s17 = sand.u32 1, %s770_s16   ;;  %p1193_p7 = scmp.ne.s32.totalorder %s1182_s26, 0 }
  0x85   : > { %s450_s29 = sshll.u32 %s229_s17, 4  ;;  %s230_s11 = scalar_lea.sflag [#allocation3], %s229_s17 }
  0x86   : > { %s233_s5 = scalar_lea.vmem [#allocation8], %s450_s29 }
  0x87   : > { %745 = dma.done.wait (%p1193_p7), %s230_s11, 256  }
  0x88   : > { %747 = vsyncadd (%p1193_p7), %s230_s11, 4294967040 }
  0x89   : > { %238 = sfence }
  0x8a   : > { %s1194_s9 = sld [smem:[#allocation15_spill]]  ;;  %s254_s3 = sand.u32 1, %s758_s13   ;;  %v275_v0 = vlaneseq  ;;  %v265_v3 = vld [vmem:[%s233_s5] sm:$0xff]  ;;  %v266_v5 = vld [vmem:[%s233_s5 + $0x8] sm:$0xff]  ;;  %vm286_vm2 = vcmask 195584   ;;  %vm289_vm3 = vcmask 261312  }
  0x8b   : > { %s267_s30 = sld [smem:[#allocation2 + %s782_s19]]  ;;  %s451_s25 = sshll.u32 %s254_s3, 4  ;;  %v809_v16 = vmov 0.0  }
  0x8c   : > { %s271_s7 = sld [smem:[#allocation7 + %s782_s19]]  ;;  %v276_v1 = vshrl.u32 %v275_v0, 7  ;;  %s452_s4 = sshll.u32 %s778_s18, 4 }
  0x8d   : > { %v279_v2 = vstv %s452_s4  ;;  %s454_s26 = sshll.u32 %s778_s18, 1  ;;  %s455_s8 = sshll.u32 %s782_s19, 2 }
  0x8e   : > { %v280_v4 = vadd.s32 %v279_v2, %v276_v1  ;;  %v277_v6 = vadd.s32 8, %v276_v1  ;;  %s305_s15 = sadd.s32 %s455_s8, %s454_s26  ;;  %s256_s6 = scalar_lea.vmem [#allocation9], %s451_s25 }
  0x8f   : > { %s310_s1 = sshll.u32 %s256_s6, 4  ;;  %s1195_s17 = sld [smem:[#allocation23_spill]]  ;;  %s1074_s1 = int_to_ptr.vmem [resolvable:$true] %s310_s1 }
  0x90   : > { %s461_s0 = smul.u32 12, %s1194_s9  ;;  %v281_v8 = vadd.s32 %v279_v2, %v277_v6  ;;  %vm282_vm0 = vcmp.lt.s32.totalorder %v280_v4, 24  ;;  %s1083_s5 = scalar_lea.sflag [#allocation4], %s254_s3 }
  0x91   : > { %v268_v7 = vstv %s267_s30  ;;  %s656_s9 = scalar_lea.vmem %s1074_s1, 256  ;;  %p1197_p3 = scmp.ne.s32.totalorder %s1186_s10, 0 }
  0x92   : > { %s307_s21 = sadd.s32 %s461_s0, %s305_s15  ;;  %v269_v9 = vsub.f32 %v265_v3, %v268_v7  ;;  %v272_v10 = vstv %s271_s7  ;;  %v270_v11 = vsub.f32 %v266_v5, %v268_v7  ;;  %vm283_vm1 = vcmp.lt.s32.totalorder %v281_v8, 24  ;;  %p657_p8 = scmp.ne.s32.totalorder %s1074_s1, %s656_s9 }
  0x93   : > { %s456_s27 = sshll.u32 %s307_s21, 7  ;;  %s810_s30 = smov [#allocation9]  }
  0x94   : > { %v273_v12 = vmul.f32 %v272_v10, %v269_v9  ;;  %v274_v13 = vmul.f32 %v272_v10, %v270_v11  ;;  %p658_p5 = pnand %p657_p8, %p1197_p3  ;;  %s660_s25 = sshll.u32 %s810_s30, 4  ;;  %s661_s25 = int_to_ptr.vmem [resolvable:$false] %s660_s25 }
  0x95   : > { %s1196_s29 = smov %s1195_s17  ;;  %s1079_s11 = scalar_lea.hbm %s1195_s17, %s456_s27 }
  0x96   : > { %v284_v14 = vsel %vm282_vm0, %v273_v12, 0.0  ;;  %v285_v15 = vsel %vm283_vm1, %v274_v13, 0.0  ;;  %p659_p11 = pneg %p658_p5  ;;  %s662_s7 = scalar_lea.vmem %s661_s25, 512 }
  0x97   : > { %287 = vst.msk [vmem:[%s256_s6] sm:$0xff] %vm286_vm2, %v284_v14  ;;  %288 = vst.msk [vmem:[%s256_s6 + $0x8] sm:$0xff] %vm286_vm2, %v285_v15  ;;  %p663_p13 = scmp.lt.s32.totalorder %s1074_s1, %s661_s25  ;;  %p664_p1 = scmp.lt.s32.totalorder %s662_s7, %s656_s9 }
  0x98   : > { %290 = vst.msk [vmem:[%s256_s6] sm:$0xff] %vm289_vm3, %v809_v16  ;;  %291 = vst.msk [vmem:[%s256_s6 + $0x8] sm:$0xff] %vm289_vm3, %v809_v16 }
  0x99   : > { %p665_p2 = por %p664_p1, %p663_p13 }
  0x9b   : > { %p666_p6 = pnand %p665_p2, %p659_p11 }
  0x9d   : > { %669 = shalt.err (!%p666_p6)
}
  0x9e   : > { %s670_s3 = scalar_lea.hbm %s1079_s11, 256  ;;  %s674_s8 = scalar_lea.hbm %s1196_s29, 3072 }
  0x9f   : > { %p671_p9 = scmp.ne.s32.totalorder %s1079_s11, %s670_s3  ;;  %p675_p0 = scmp.lt.u32.totalorder %s1079_s11, %s1196_s29 }
  0xa0   : > { %p676_p4 = scmp.lt.u32.totalorder %s674_s8, %s670_s3  ;;  %p678_p8 = scmp.lt.u32.totalorder %s670_s3, %s1079_s11 }
  0xa1   : > { %p672_p10 = pnand %p671_p9, %p1197_p3 }
  0xa2   : > { %p677_p7 = por %p676_p4, %p675_p0 }
  0xa3   : > { %p673_p12 = pneg %p672_p10 }
  0xa4   : > { %p679_p5 = por %p678_p8, %p677_p7 }
  0xa6   : > { %p680_p11 = pnand %p679_p5, %p673_p12 }
  0xa8   : > { %683 = shalt.err (!%p680_p11)
}
  0xa9   : > { %s811_s21 = smov 128   ;;  %s812_s6 = smov 8  }
  0xaa   : > { %471 = dma.vmem_to_hbm [thread:$0]  (%p1197_p3), %s1074_s1, 256, %s1079_s11, %s1083_s5, %s811_s21, %s811_s21, %s812_s6  }
  0xab PF: > { %p488_p13 = scmp.ge.s32.totalorder %s802_s24, 2  ;;  %s325_s27 = sand.u32 1, %s754_s12  }
  0xac   : > { %p1198_p1 = scmp.ne.s32.totalorder %s1187_s28, 0  ;;  %s326_s18 = scalar_lea.sflag [#allocation4], %s325_s27 }
  0xae   : > { %p481_p2 = pnand %p488_p13, %p1198_p1 }
  0xb0   : > { %749 = dma.done.wait (!%p481_p2), %s326_s18, 256  }
  0xb1   : > { %751 = vsyncadd (!%p481_p2), %s326_s18, 4294967040  ;;  %s21_s24 = sadd.s32 1, %s802_s24   ;;  %s1200_s10 = sld [smem:[#allocation14_spill]] }
  0xb2   : > { %p1112_p6 = scmp.ge.s32.totalorder %s21_s24, 14   ;;  %s1201_s17 = sld [smem:[#allocation20_spill]] }
  0xb3   : > { %s1202_s18 = sld [smem:[#allocation16_spill]]  ;;  %s1203_s21 = sld [smem:[#allocation17_spill]] }
  0xb4   : > { %s1204_s28 = sld [smem:[#allocation18_spill]]  ;;  %s1205_s1 = sld [smem:[#allocation19_spill]] }
  0xb5   : > { %s1207_s12 = smov %s758_s13  ;;  %s1208_s13 = smov %s762_s14 }
  0xb6   : > { %s1209_s14 = smov %s953_s20  ;;  %s1210_s15 = smov %s770_s16 }
  0xb7   : > { %s1211_s16 = smov %s1200_s10  ;;  %s1212_s19 = smov %s794_s22 }
  0xb8   : > { %s1213_s20 = smov %s798_s23  ;;  %20 = sbr.rel (!%p1112_p6) target bundleno = 16 (0x10), region = 87 }
  0xba   : > { %s1214_s22 = smov %s1204_s28  ;;  %s1215_s23 = smov %s1205_s1 }
  0xbf   :  { %331 = vsyncpa [#allocation3], 1 }
  0xc0   :  { %333 = vsyncpa [#allocation3 + $0x1], 1 }
  0xc1   :  { %334 = vsyncpa [#allocation4], 1 }
  0xc2   :  { %336 = vsyncpa [#allocation4 + $0x1], 1 }
  0xc3   :  { %337 = vsyncpa [#allocation5], 1 }
  0xc4   :  { %339 = vsyncpa [#allocation5 + $0x1], 1 }
  0xc5   :  { %340 = vsyncpa [#allocation6], 1 }
  0xc6   :  { %342 = vsyncpa [#allocation6 + $0x1], 1 }

</bundles_post_ra>
